<compile_context>
chip_gen: v5e
topology: v5e:2x2
jax: 0.10.0
libtpu: 0.0.40
codegen_flags: <defaults>
</compile_context>

<pallas_src>
import functools

import jax
import jax.numpy as jnp
from jax import lax
from jax.experimental import pallas as pl
from jax.experimental.pallas import tpu as pltpu

ALPHA = 1.0
GAMMA = 2.0


def _round_up(v, m):
    return ((v + m - 1) // m) * m


def _vmem_limit_bytes():
    """~75% of physical VMEM per generation, capped at 96 MiB (v5e/v6e-friendly)."""
    try:
        cap = int(pltpu.get_tpu_info().vmem_capacity_bytes)
    except Exception:
        cap = 64 * 1024 * 1024  # conservative: v7x per-TC physical VMEM
    return int(min(0.75 * cap, 96 * 1024 * 1024))


def _focal_loss_kernel(x_ref, t_ref, o_ref, *, n_rows, tile_n, tiles_per_split):
    # x_ref: (tile_n, C) logits tile (native dtype)
    # t_ref: (tile_n, 1) int32 targets tile
    # o_ref: (1, 8, 128) f32 grid-resident partial CE-sum block for this split
    split = pl.program_id(0)
    step = pl.program_id(1)

    @pl.when(step == 0)
    def _init():
        o_ref[...] = jnp.zeros_like(o_ref)

    x = x_ref[...]                                   # (tile_n, C) native dtype
    t = t_ref[...]                                   # (tile_n, 1) int32

    # Global row ids for this logical tile slot (independent of any DMA clamping).
    tile_idx = split * tiles_per_split + step
    row_ids = tile_idx * tile_n + lax.broadcasted_iota(jnp.int32, (tile_n, 1), 0)
    valid = row_ids < n_rows                         # (tile_n, 1) bool

    # Zero padded / out-of-range rows BEFORE any max/exp/log (robust raggedness).
    x = jnp.where(valid, x, jnp.zeros_like(x))

    # bf16 inputs: keep max / subtract / one-hot select in bf16; upcast for exp/log.
    xc = x if x.dtype == jnp.bfloat16 else x.astype(jnp.float32)

    m = jnp.max(xc, axis=-1, keepdims=True)                          # (tile_n, 1)
    diff = (xc - m).astype(jnp.float32)                              # (tile_n, C)
    lse = jnp.log(jnp.sum(jnp.exp(diff), axis=-1, keepdims=True)) + m.astype(jnp.float32)

    cls_ids = lax.broadcasted_iota(jnp.int32, xc.shape, 1)           # (tile_n, C)
    tgt = jnp.sum(jnp.where(cls_ids == t, xc, jnp.zeros_like(xc)).astype(jnp.float32),
                  axis=-1, keepdims=True)                            # (tile_n, 1)

    ce_per_row = lse - tgt                                           # (tile_n, 1)
    tile_sum = jnp.sum(jnp.where(valid, ce_per_row, 0.0))            # scalar f32

    # Accumulate (scalar broadcast over one vreg -> cheap unmasked store).
    o_ref[...] += tile_sum


def focal_loss(logits, targets, *, tile_n=None, n_splits=None):
    """logits: (N, C) float (f32 or bf16), targets: (N,) int -> scalar f32 focal loss."""
    n, c = logits.shape
    itemsize = int(jnp.dtype(logits.dtype).itemsize)
    sublane = 16 if logits.dtype == jnp.bfloat16 else 8

    vmem_limit = _vmem_limit_bytes()

    if tile_n is None:
        # Live bytes per row in the body: double-buffered input DMA (2*itemsize per
        # element) + ~5 full-width f32 temporaries (upcast/diff/exp/iota/select).
        per_row = c * (2 * itemsize + 5 * 4)
        tile_n = max(sublane, (vmem_limit // 2) // max(1, per_row))
    tile_n = _round_up(min(tile_n, _round_up(n, sublane)), sublane)

    total_tiles = pl.cdiv(n, tile_n)
    if n_splits is None:
        # TODO(synk): query the TensorCore count per generation; 2 uses both v7x
        # cores and is a harmless 2-step parallel axis on single-core v5e/v6e.
        n_splits = 2 if total_tiles >= 2 else 1
    tiles_per_split = pl.cdiv(total_tiles, n_splits)
    max_block = total_tiles - 1

    def row_map(s, i):
        # Clamp so an uneven split never addresses a fully out-of-bounds block;
        # the duplicated read is masked out via row_ids inside the kernel.
        return (jnp.minimum(s * tiles_per_split + i, max_block), 0)

    t2d = targets.astype(jnp.int32).reshape(n, 1)

    kernel = functools.partial(_focal_loss_kernel, n_rows=n, tile_n=tile_n,
                               tiles_per_split=tiles_per_split)

    cost = pl.CostEstimate(
        flops=5 * n * c,
        transcendentals=n * c + n,
        bytes_accessed=n * c * itemsize + n * 4 + n_splits * 8 * 128 * 4,
    )

    partials = pl.pallas_call(
        kernel,
        out_shape=jax.ShapeDtypeStruct((n_splits, 8, 128), jnp.float32),
        grid=(n_splits, tiles_per_split),
        in_specs=[
            pl.BlockSpec((tile_n, c), row_map),
            pl.BlockSpec((tile_n, 1), row_map),
        ],
        out_specs=pl.BlockSpec((1, 8, 128), lambda s, i: (s, 0, 0)),
        compiler_params=pltpu.CompilerParams(
            dimension_semantics=("parallel", "arbitrary"),
            vmem_limit_bytes=vmem_limit,
        ),
        cost_estimate=cost,
    )(logits, t2d)

    # Finalize in the wrapper: sum per-split partials, mean, focal modulation.
    ce = jnp.sum(partials[:, 0, 0]) / jnp.float32(n)
    pt = jnp.exp(-ce)
    return jnp.float32(ALPHA) * (1.0 - pt) ** GAMMA * ce


def _ref_focal_loss(logits, targets):
    n = logits.shape[0]
    lse = jax.scipy.special.logsumexp(logits.astype(jnp.float32), axis=-1)
    ce = jnp.mean(lse - logits.astype(jnp.float32)[jnp.arange(n), targets])
    return ALPHA * (1.0 - jnp.exp(-ce)) ** GAMMA * ce


if __name__ == "__main__":
    key = jax.random.PRNGKey(0)
    k1, k2, k3, k4, k5, k6 = jax.random.split(key, 6)

    # Case 1: small shape consistent with the module (N=8 samples, C=32 classes).
    N1, C1 = 8, 32
    logits1 = jax.random.normal(k1, (N1, C1), dtype=jnp.float32)
    targets1 = jax.random.randint(k2, (N1,), 0, C1, dtype=jnp.int32)
    loss1 = jax.block_until_ready(focal_loss(logits1, targets1))
    ref1 = _ref_focal_loss(logits1, targets1)
    assert jnp.allclose(loss1, ref1, rtol=1e-5, atol=1e-5), (loss1, ref1)

    # Case 2: multi-tile accumulation + ragged last tile + 2-way parallel split.
    N2, C2 = 56, 32
    logits2 = jax.random.normal(k3, (N2, C2), dtype=jnp.float32)
    targets2 = jax.random.randint(k4, (N2,), 0, C2, dtype=jnp.int32)
    loss2 = jax.block_until_ready(focal_loss(logits2, targets2, tile_n=16))
    ref2 = _ref_focal_loss(logits2, targets2)
    assert jnp.allclose(loss2, ref2, rtol=1e-5, atol=1e-5), (loss2, ref2)

    # Case 3: odd tile count -> one clamped (fully masked) tile slot on split 1.
    N3, C3 = 40, 32
    logits3 = jax.random.normal(k5, (N3, C3), dtype=jnp.float32)
    targets3 = jax.random.randint(k6, (N3,), 0, C3, dtype=jnp.int32)
    loss3 = jax.block_until_ready(focal_loss(logits3, targets3, tile_n=16, n_splits=2))
    ref3 = _ref_focal_loss(logits3, targets3)
    assert jnp.allclose(loss3, ref3, rtol=1e-5, atol=1e-5), (loss3, ref3)

    print("KERNEL_OK")
</pallas_src>

<mosaic_0001>
module attributes {stable_mosaic.version = 11 : i64} {
  func.func @_focal_loss_kernel(%arg0: i32, %arg1: i32, %arg2: memref<8x32xf32, #tpu.memory_space<vmem>>, %arg3: memref<8x1xi32, #tpu.memory_space<vmem>>, %arg4: memref<1x8x128xf32, #tpu.memory_space<vmem>>) attributes {dimension_semantics = [#tpu.dimension_semantics<parallel>, #tpu.dimension_semantics<arbitrary>], iteration_bounds = array<i64: 1, 1>, scalar_prefetch = 0 : i64, scratch_operands = 0 : i64, tpu.core_type = #tpu.core_type<tc>, window_params = [{transform_indices = @transform_0, window_bounds = array<i64: 8, 32>}, {transform_indices = @transform_1, window_bounds = array<i64: 8, 1>}, {transform_indices = @transform_2, window_bounds = array<i64: 1, 8, 128>}]} {
    %c0_i32 = arith.constant 0 : i32
    %0 = arith.cmpi eq, %arg1, %c0_i32 : i32
    %1 = arith.extui %0 : i1 to i32
    %c0_i32_0 = arith.constant 0 : i32
    %2 = arith.cmpi ne, %1, %c0_i32_0 : i32
    scf.if %2 {
      %cst_17 = arith.constant 0.000000e+00 : f32
      %44 = vector.broadcast %cst_17 : f32 to vector<1x8x128xf32>
      %c0_18 = arith.constant 0 : index
      %c0_19 = arith.constant 0 : index
      %c0_20 = arith.constant 0 : index
      %45 = vector.load %arg4[%c0_18, %c0_19, %c0_20] : memref<1x8x128xf32, #tpu.memory_space<vmem>>, vector<1x8x128xf32>
      tpu.vector_store %arg4[%c0_18, %c0_19, %c0_20], %44 {strides = array<i32>} : memref<1x8x128xf32, #tpu.memory_space<vmem>>, vector<1x8x128xf32>,
    } else {
    }
    %c0 = arith.constant 0 : index
    %c0_1 = arith.constant 0 : index
    %3 = vector.load %arg2[%c0, %c0_1] : memref<8x32xf32, #tpu.memory_space<vmem>>, vector<8x32xf32>
    %c0_2 = arith.constant 0 : index
    %c0_3 = arith.constant 0 : index
    %4 = vector.load %arg3[%c0_2, %c0_3] : memref<8x1xi32, #tpu.memory_space<vmem>>, vector<8x1xi32>
    %c1_i32 = arith.constant 1 : i32
    %5 = arith.muli %arg0, %c1_i32 : i32
    %6 = arith.addi %5, %arg1 : i32
    %c8_i32 = arith.constant 8 : i32
    %7 = arith.muli %6, %c8_i32 : i32
    %8 = tpu.iota {dimensions = array<i32: 0>} : vector<8x1xi32>
    %9 = vector.broadcast %7 : i32 to vector<8x1xi32>
    %10 = arith.addi %9, %8 : vector<8x1xi32>
    %c8_i32_4 = arith.constant 8 : i32
    %11 = vector.broadcast %c8_i32_4 : i32 to vector<8x1xi32>
    %12 = arith.cmpi slt, %10, %11 : vector<8x1xi32>
    %cst = arith.constant 0.000000e+00 : f32
    %13 = vector.broadcast %cst : f32 to vector<8x32xf32>
    %14 = vector.shape_cast %12 : vector<8x1xi1> to vector<8x1xi1>
    %15 = vector.broadcast %14 : vector<8x1xi1> to vector<8x32xi1>
    %16 = arith.select %15, %3, %13 : vector<8x32xi1>, vector<8x32xf32>
    %cst_5 = arith.constant dense<0xFF800000> : vector<8xf32>
    %17 = vector.multi_reduction <maximumf>, %16, %cst_5 [1] : vector<8x32xf32> to vector<8xf32>
    %18 = vector.shape_cast %17 : vector<8xf32> to vector<8x1xf32>
    %19 = vector.broadcast %18 : vector<8x1xf32> to vector<8x32xf32>
    %20 = arith.subf %16, %19 : vector<8x32xf32>
    %21 = math.exp %20 : vector<8x32xf32>
    %cst_6 = arith.constant dense<0.000000e+00> : vector<8xf32>
    %22 = vector.multi_reduction <add>, %21, %cst_6 [1] : vector<8x32xf32> to vector<8xf32>
    %23 = vector.shape_cast %22 : vector<8xf32> to vector<8x1xf32>
    %24 = math.log %23 : vector<8x1xf32>
    %25 = arith.addf %24, %18 : vector<8x1xf32>
    %26 = tpu.iota {dimensions = array<i32: 1>} : vector<8x32xi32>
    %27 = vector.broadcast %4 : vector<8x1xi32> to vector<8x32xi32>
    %28 = arith.cmpi eq, %26, %27 : vector<8x32xi32>
    %cst_7 = arith.constant 0.000000e+00 : f32
    %29 = vector.broadcast %cst_7 : f32 to vector<8x32xf32>
    %30 = arith.select %28, %16, %29 : vector<8x32xi1>, vector<8x32xf32>
    %cst_8 = arith.constant dense<0.000000e+00> : vector<8xf32>
    %31 = vector.multi_reduction <add>, %30, %cst_8 [1] : vector<8x32xf32> to vector<8xf32>
    %32 = vector.shape_cast %31 : vector<8xf32> to vector<8x1xf32>
    %33 = arith.subf %25, %32 : vector<8x1xf32>
    %cst_9 = arith.constant 0.000000e+00 : f32
    %34 = vector.broadcast %cst_9 : f32 to vector<8x1xf32>
    %35 = arith.select %12, %33, %34 : vector<8x1xi1>, vector<8x1xf32>
    %36 = vector.shape_cast %35 : vector<8x1xf32> to vector<1x8x1xf32>
    %cst_10 = arith.constant dense<0.000000e+00> : vector<1xf32>
    %37 = vector.multi_reduction <add>, %36, %cst_10 [1, 2] : vector<1x8x1xf32> to vector<1xf32>
    %38 = vector.shape_cast %37 : vector<1xf32> to vector<1x1x1xf32>
    %39 = vector.extract %38[0, 0, 0] : f32 from vector<1x1x1xf32>
    %c0_11 = arith.constant 0 : index
    %c0_12 = arith.constant 0 : index
    %c0_13 = arith.constant 0 : index
    %40 = vector.load %arg4[%c0_11, %c0_12, %c0_13] : memref<1x8x128xf32, #tpu.memory_space<vmem>>, vector<1x8x128xf32>
    %41 = vector.broadcast %39 : f32 to vector<1x8x128xf32>
    %42 = arith.addf %40, %41 : vector<1x8x128xf32>
    %c0_14 = arith.constant 0 : index
    %c0_15 = arith.constant 0 : index
    %c0_16 = arith.constant 0 : index
    %43 = vector.load %arg4[%c0_14, %c0_15, %c0_16] : memref<1x8x128xf32, #tpu.memory_space<vmem>>, vector<1x8x128xf32>
    tpu.vector_store %arg4[%c0_14, %c0_15, %c0_16], %42 {strides = array<i32>} : memref<1x8x128xf32, #tpu.memory_space<vmem>>, vector<1x8x128xf32>,
    return
  }
  func.func @transform_0(%arg0: i32, %arg1: i32) -> (i32, i32) {
    %c1_i32 = arith.constant 1 : i32
    %0 = arith.muli %arg0, %c1_i32 : i32
    %1 = arith.addi %0, %arg1 : i32
    %c0_i32 = arith.constant 0 : i32
    %2 = arith.minsi %1, %c0_i32 : i32
    %c0_i32_0 = arith.constant 0 : i32
    %c0_i32_1 = arith.constant 0 : i32
    return %2, %c0_i32_0 : i32, i32
  }
  func.func @transform_1(%arg0: i32, %arg1: i32) -> (i32, i32) {
    %c1_i32 = arith.constant 1 : i32
    %0 = arith.muli %arg0, %c1_i32 : i32
    %1 = arith.addi %0, %arg1 : i32
    %c0_i32 = arith.constant 0 : i32
    %2 = arith.minsi %1, %c0_i32 : i32
    %c0_i32_0 = arith.constant 0 : i32
    %c0_i32_1 = arith.constant 0 : i32
    return %2, %c0_i32_0 : i32, i32
  }
  func.func @transform_2(%arg0: i32, %arg1: i32) -> (i32, i32, i32) {
    %c0_i32 = arith.constant 0 : i32
    %c0_i32_0 = arith.constant 0 : i32
    %c0_i32_1 = arith.constant 0 : i32
    return %arg0, %c0_i32, %c0_i32_0 : i32, i32, i32
  }
}

</mosaic_0001>

<bundles_post_ra>
// kernel: tpu_custom_call.1
= control target key start
LH: loop header
LB: loop body
LE: loop exit
PB: predicated region body
PF: predicated region fallthrough
CT: control target
= control target key end

     0   :  { %vm83_vm0 = vcmask 261120   ;;  %s216_s0 = inlined_call_operand.vmem [shape: f32[8,32], index: 0, kind: input, shape index: {}]   ;;  %s217_s1 = inlined_call_operand.vmem [shape: s32[8,1], index: 1, kind: input, shape index: {}]   ;;  %s218_s2 = inlined_call_operand.hbm [shape: f32[1,8,128], index: 2, kind: output, shape index: {}]  }
   0x1   :  { %v71_v0 = vld [vmem:[%s216_s0] sm:$0xff] }
   0x2   :  { %7 = vsyncpa [#allocation3], 0  ;;  %v84_v1 = vsel %vm83_vm0, %v71_v0, -inf  ;;  %v187_v2 = vmov 0   ;;  %v72_v3 = vld [vmem:[%s217_s1] sm:$0xff]  ;;  %v96_v9 = vlaneseq  ;;  %vm108_vm2 = vcmask 7168  }
   0x3   :  { %156 = vset.pattern.permute.xlu0 %v187_v2  ;;  %s188_s0 = smov [#allocation2]   ;;  %s130_s15 = sshll.u32 %s218_s2, 4  ;;  %s131_s15 = int_to_ptr.hbm [resolvable:$true] %s130_s15 }
   0x4   :  { %85 = vmax.xlane.f32.xlu0 %v84_v1  ;;  %v97_v10 = vand.u32 127, %v96_v9  ;;  %s128_s1 = sshll.u32 %s188_s0, 4  ;;  %s129_s1 = int_to_ptr.vmem [resolvable:$true] %s128_s1 }
  0x18   :  { %99 = vperm.xlu0 %156, %v72_v3  }
  0x77   :  { %v86_v4 = vpop.xlane.xlu0 %85 }
  0x78   :  { %v87_v5 = vsub.f32 %v71_v0, %v86_v4 }
  0x7a   :  { %v88_v6 = vmul.f32 1.442695, %v87_v5 }
  0x7c   :  { %157 = vpow2.f32 %v88_v6 }
  0x82   :  { %v158_v7 = vpop.eup %157 }
  0x83   :  { %v90_v8 = vsel %vm83_vm0, %v158_v7, 0.0 }
  0x84   :  { %91 = vadd.xlane.f32.xlu1 %v90_v8 }
  0x8a   :  { %v100_v11 = vpop.permute.xlu0 %99 }
  0x8b   :  { %vm101_vm1 = vcmp.eq.s32.totalorder %v97_v10, %v100_v11 }
  0x8c   :  { %v102_v12 = vsel %vm101_vm1, %v71_v0, 0.0 }
  0x8d   :  { %v103_v13 = vsel %vm83_vm0, %v102_v12, 0.0 }
  0x8e   :  { %104 = vadd.xlane.f32.xlu1 %v103_v13 }
  0xf7   :  { %v92_v14 = vpop.xlane.xlu1 %91 }
  0xf8   :  { %159 = vlog2.f32 %v92_v14 }
  0xfe   :  { %v160_v15 = vpop.eup %159 }
  0xff   :  { %v94_v16 = vmul.f32 0.6931472, %v160_v15 }
 0x101   :  { %v95_v17 = vadd.f32 %v94_v16, %v86_v4  ;;  %v105_v18 = vpop.xlane.xlu1 %104 }
 0x103   :  { %v106_v19 = vsub.f32 %v95_v17, %v105_v18 }
 0x105   :  { %v109_v20 = vsel %vm108_vm2, %v106_v19, 0.0 }
 0x106   :  { %110 = vadd.xlane.f32.xlu2 %v109_v20 }
 0x179   :  { %v111_v21 = vpop.xlane.xlu2 %110 }
 0x17a   :  { %v112_v22 = vrot.slane %v111_v21, 4 }
 0x17c   :  { %v113_v23 = vadd.f32 %v112_v22, %v111_v21 }
 0x17e   :  { %v114_v24 = vrot.slane %v113_v23, 2 }
 0x180   :  { %v115_v25 = vadd.f32 %v114_v24, %v113_v23 }
 0x182   :  { %v116_v26 = vrot.slane %v115_v25, 1 }
 0x184   :  { %v117_v27 = vadd.f32 %v116_v26, %v115_v25 }
 0x186   :  { %151 = vpush %v117_v27 }
 0x1b7   :  { %s152_s16 = spop %151 }
 0x1b8   :  { %v120_v28 = vstv %s152_s16 }
 0x1b9   :  { %122 = vst [vmem:[#allocation2] sm:$0xff] %v120_v28 }
 0x1ba   :  { %133 = dma.vmem_to_hbm [thread:$0]  %s129_s1, 128, %s131_s15, [#allocation3]  }
 0x1bb   :  { %185 = dma.done.wait [#allocation3], 128  }
 0x1bc   :  { %186 = vsyncadd [#allocation3], 4294967168 }
 0x1bd   :  { %138 = vsyncpa [#allocation3], 1 }

</bundles_post_ra>
